<compile_context>
chip_gen: v5e
topology: v5e:2x2
jax: 0.10.0
libtpu: 0.0.40
codegen_flags: <defaults>
</compile_context>

<pallas_src>
import math

import jax
import jax.numpy as jnp
from jax import lax
from jax.experimental import pallas as pl
from jax.experimental.pallas import tpu as pltpu

LN_EPS = 1e-5  # nn.LayerNorm default
_INV_SQRT2 = 1.0 / math.sqrt(2.0)


def _round_up(a, b):
    return (a + b - 1) // b * b


def _cdiv(a, b):
    return (a + b - 1) // b


def _vmem_capacity_bytes():
    try:
        return int(pltpu.get_tpu_info().vmem_capacity_bytes)
    except Exception:
        return 64 * 1024 * 1024  # conservative (v7x-sized) fallback


def _gelu_f32(h):
    # exact erf GELU (models.gelu)
    return 0.5 * h * (1.0 + lax.erf(h * _INV_SQRT2))


def _residual_layernorm(x_f32, y_f32, ep_f32, out_dtype):
    # dropout is identity in eval mode; ep rows are [b2; gamma; beta]
    z = x_f32 + y_f32 + ep_f32[0:1, :]
    mean = jnp.mean(z, axis=-1, keepdims=True)
    d = z - mean
    var = jnp.mean(d * d, axis=-1, keepdims=True)
    zn = d * lax.rsqrt(var + LN_EPS)
    return (zn * ep_f32[1:2, :] + ep_f32[2:3, :]).astype(out_dtype)


def _single_pass_kernel(x_ref, w1_ref, b1_ref, w2_ref, ep_ref, out_ref):
    """Whole active FFN width in one step: weights grid-resident, no scratch."""
    x = x_ref[...]
    h = jnp.dot(x.astype(w1_ref.dtype), w1_ref[...],
                preferred_element_type=jnp.float32)
    h = _gelu_f32(h + b1_ref[...].astype(jnp.float32))
    y = jnp.dot(h.astype(w2_ref.dtype), w2_ref[...],
                preferred_element_type=jnp.float32)
    out_ref[...] = _residual_layernorm(
        x.astype(jnp.float32), y, ep_ref[...].astype(jnp.float32), out_ref.dtype)


def _multi_pass_kernel(x_ref, w1_ref, b1_ref, w2_ref, ep_ref, out_ref, acc_ref):
    """F-tiled fallback (reduction axis last, f32 VMEM accumulator)."""
    k = pl.program_id(1)

    @pl.when(k == 0)
    def _init():
        acc_ref[...] = jnp.zeros_like(acc_ref)

    h = jnp.dot(x_ref[...].astype(w1_ref.dtype), w1_ref[...],
                preferred_element_type=jnp.float32)
    h = _gelu_f32(h + b1_ref[...].astype(jnp.float32))
    # Inactive FFN columns (if the last tile over-covers F) hit W2 rows that
    # were zeroed in the wrapper, so no in-kernel mask is needed here.
    acc_ref[...] += jnp.dot(h.astype(w2_ref.dtype), w2_ref[...],
                            preferred_element_type=jnp.float32)

    @pl.when(k == pl.num_programs(1) - 1)
    def _finalize():
        out_ref[...] = _residual_layernorm(
            x_ref[...].astype(jnp.float32), acc_ref[...],
            ep_ref[...].astype(jnp.float32), out_ref.dtype)


def _select_tiles(M, H, F, max_f, x_bytes, w_bytes, out_bytes, budget,
                  tm_pref, tf_cap=None):
    # ---- F tile candidates (all divide the full-F tile, so coverage <= max_F)
    if max_f % 128 == 0:
        tf_full = min(_round_up(F, 128), max_f)
        cands = [tf_full]
        t = tf_full
        while t % 256 == 0:
            t //= 2
            cands.append(t)
        if cands[-1] != 128:
            cands.append(128)
    else:
        tf_full = max_f            # lane dim must equal the full array extent
        cands = [max_f]
    if tf_cap is not None:
        capped = [c for c in cands if c <= tf_cap]
        cands = capped if capped else [cands[-1]]

    # ---- token tile
    tm = _round_up(max(8, min(tm_pref, M)), 8)
    # keep >= 2 token tiles for large M so the "parallel" axis feeds both
    # TensorCores on v7x (megacore)
    if M >= 1024 and _cdiv(M, tm) < 2:
        tm = _round_up(_cdiv(M, 2), 8)

    def vmem_need(tm_, tf_):
        need = 2 * tm_ * H * x_bytes              # x tile (double-buffered)
        need += 2 * tm_ * H * out_bytes           # out tile
        need += tm_ * H * 4                       # f32 accumulator scratch
        need += 2 * 2 * H * tf_ * w_bytes         # W1 + W2 tiles (double-buffered)
        need += 2 * tf_ * w_bytes + 2 * 3 * H * 4  # b1 tile + [b2;gamma;beta]
        return need

    tf = cands[0]
    for cand in cands:
        tf = cand
        if vmem_need(tm, tf) <= budget:
            break
    while vmem_need(tm, tf) > budget and tm > 256:
        tm = _round_up(max(8, tm // 2), 8)
    return tm, tf


def supernet_ffn_forward(hidden_states, params, *, active_ffn, tm=1024,
                         compute_dtype=None, tf_cap=None):
    """Pallas forward. Returns (output, pca_sum) like the torch module.

    compute_dtype: optional dtype (e.g. jnp.bfloat16) for the weight operands
      of the two matmuls. Accumulation is always f32; residual + LayerNorm use
      the original-precision x in f32.
    tf_cap: optional upper bound on the F tile (testing / tuning knob).
    """
    B, S, H = hidden_states.shape
    M = B * S
    x = hidden_states.reshape(M, H)

    w1 = params["w1"]              # (H, max_F)
    b1 = params["b1"]              # (1, max_F)
    w2 = params["w2"]              # (max_F, H)
    max_f = w1.shape[1]
    F = int(active_ffn)
    assert 0 < F <= max_f

    if compute_dtype is not None:
        # bf16 weights: halves HBM weight traffic, native MXU path on all gens.
        w1 = w1.astype(compute_dtype)
        w2 = w2.astype(compute_dtype)

    # b2 / gamma / beta share a single grid-resident (3, H) block.
    eparams = jnp.concatenate([params["b2"], params["gamma"], params["beta"]],
                              axis=0)

    capacity = _vmem_capacity_bytes()
    vmem_limit = int(0.75 * capacity)   # headroom for Mosaic internal scratch
    budget = int(0.60 * capacity)       # target for data tiles

    x_bytes = x.dtype.itemsize
    w_bytes = w1.dtype.itemsize
    out_bytes = hidden_states.dtype.itemsize
    tm, tf = _select_tiles(M, H, F, max_f, x_bytes, w_bytes, out_bytes,
                           budget, tm, tf_cap)

    n_f = _cdiv(F, tf)
    covered = n_f * tf
    assert covered <= max_f
    if covered > F:
        # Zero inactive W2 rows once in the wrapper so garbage h columns of the
        # over-covering last F tile contribute exactly nothing (no kernel mask).
        row = jnp.arange(max_f, dtype=jnp.int32)[:, None]
        w2 = jnp.where(row < F, w2, jnp.zeros_like(w2))

    # Token tiling with zero-padded remainder rows.
    M_pad = _round_up(M, tm)
    if M_pad != M:
        x = jnp.pad(x, ((0, M_pad - M), (0, 0)))
    n_m = M_pad // tm

    if n_f == 1:
        kernel = _single_pass_kernel
        grid = (n_m,)
        in_specs = [
            pl.BlockSpec((tm, H), lambda i: (i, 0)),   # x token tile
            pl.BlockSpec((H, tf), lambda i: (0, 0)),   # W1 (resident)
            pl.BlockSpec((1, tf), lambda i: (0, 0)),   # b1 (resident)
            pl.BlockSpec((tf, H), lambda i: (0, 0)),   # W2 (resident)
            pl.BlockSpec((3, H), lambda i: (0, 0)),    # [b2; gamma; beta]
        ]
        out_spec = pl.BlockSpec((tm, H), lambda i: (i, 0))
        scratch = []
        dims = ("parallel",)
    else:
        kernel = _multi_pass_kernel
        grid = (n_m, n_f)
        in_specs = [
            pl.BlockSpec((tm, H), lambda i, k: (i, 0)),   # x token tile
            pl.BlockSpec((H, tf), lambda i, k: (0, k)),   # W1 F-tile
            pl.BlockSpec((1, tf), lambda i, k: (0, k)),   # b1 F-tile
            pl.BlockSpec((tf, H), lambda i, k: (k, 0)),   # W2 F-tile
            pl.BlockSpec((3, H), lambda i, k: (0, 0)),    # [b2; gamma; beta]
        ]
        out_spec = pl.BlockSpec((tm, H), lambda i, k: (i, 0))
        scratch = [pltpu.VMEM((tm, H), jnp.float32)]
        dims = ("parallel", "arbitrary")

    # Weights are fetched once when resident (n_f == 1, constant index map),
    # otherwise re-streamed once per token tile.
    weight_passes = 1 if n_f == 1 else n_m
    cost = pl.CostEstimate(
        flops=int(4 * M_pad * H * covered),            # two matmuls, 2 flops/MAC
        transcendentals=int(M_pad * covered),          # erf per hidden activation
        bytes_accessed=int(
            x_bytes * M_pad * H + out_bytes * M_pad * H
            + weight_passes * (2 * H * covered * w_bytes
                               + covered * b1.dtype.itemsize)
            + 3 * H * eparams.dtype.itemsize),
    )

    out = pl.pallas_call(
        kernel,
        out_shape=jax.ShapeDtypeStruct((M_pad, H), hidden_states.dtype),
        grid=grid,
        in_specs=in_specs,
        out_specs=out_spec,
        scratch_shapes=scratch,
        compiler_params=pltpu.CompilerParams(
            dimension_semantics=dims,
            vmem_limit_bytes=vmem_limit,
        ),
        cost_estimate=cost,
    )(x, w1, b1, w2, eparams)

    out = out[:M].reshape(B, S, H)
    # TODO(synk): pca_torch has no clean Pallas equivalent; is_calc_pca=False path.
    pca_sum = jnp.float32(0.0)
    return out, pca_sum


def reference_forward(hidden_states, params, *, active_ffn):
    """Pure-JAX reference mirroring the PyTorch forward (eval mode)."""
    B, S, H = hidden_states.shape
    x = hidden_states.reshape(-1, H).astype(jnp.float32)
    F = active_ffn
    h = x @ params["w1"][:, :F] + params["b1"][:, :F]
    h = 0.5 * h * (1.0 + lax.erf(h / math.sqrt(2.0)))
    y = h @ params["w2"][:F, :] + params["b2"]
    z = x + y
    mean = jnp.mean(z, axis=-1, keepdims=True)
    var = jnp.mean((z - mean) ** 2, axis=-1, keepdims=True)
    out = (z - mean) / jnp.sqrt(var + LN_EPS) * params["gamma"] + params["beta"]
    return out.reshape(B, S, H)


def _make_params(key, hidden_size, max_ffn_hidden_size):
    k_w1, k_b1, k_w2, k_b2 = jax.random.split(key, 4)
    return {
        "w1": 0.05 * jax.random.normal(k_w1, (hidden_size, max_ffn_hidden_size), jnp.float32),
        "b1": 0.01 * jax.random.normal(k_b1, (1, max_ffn_hidden_size), jnp.float32),
        "w2": 0.05 * jax.random.normal(k_w2, (max_ffn_hidden_size, hidden_size), jnp.float32),
        "b2": 0.01 * jax.random.normal(k_b2, (1, hidden_size), jnp.float32),
        "gamma": jnp.ones((1, hidden_size), jnp.float32),   # nn.LayerNorm init
        "beta": jnp.zeros((1, hidden_size), jnp.float32),
    }


if __name__ == "__main__":
    key = jax.random.PRNGKey(0)
    k_x1, k_p1, k_x2, k_p2 = jax.random.split(key, 4)

    # --- Test 1: module-sized config (hidden=32, max_ffn=64, init=16, j=1 -> F=32),
    #             f32 path, single-pass kernel -------------------------------------
    hidden_size, max_ffn, init_hidden, j = 32, 64, 16, 1
    active_ffn = init_hidden * (j + 1)   # 32
    batch, seq = 2, 8
    hidden_states = jax.random.normal(k_x1, (batch, seq, hidden_size), jnp.float32)
    params = _make_params(k_p1, hidden_size, max_ffn)

    out, pca_sum = supernet_ffn_forward(hidden_states, params, active_ffn=active_ffn)
    out = jax.block_until_ready(out)
    ref = reference_forward(hidden_states, params, active_ffn=active_ffn)
    assert out.shape == (batch, seq, hidden_size)
    assert jnp.allclose(out, ref, atol=1e-5, rtol=1e-5), "f32 single-pass mismatch"

    # --- Test 2: bf16 weight-cast path (the 'biggest lever' from the review),
    #             looser tolerance as the matmuls run in bf16 ----------------------
    out_bf16, _ = supernet_ffn_forward(hidden_states, params, active_ffn=active_ffn,
                                       compute_dtype=jnp.bfloat16)
    out_bf16 = jax.block_until_ready(out_bf16)
    assert jnp.allclose(out_bf16, ref, atol=2e-2, rtol=2e-2), "bf16 path mismatch"

    # --- Test 3: force the F-tiled multi-pass kernel (tf_cap) with a partial
    #             last F tile (F=192 on max_ffn=256, tf=128) -----------------------
    hidden2, max_ffn2, active2 = 32, 256, 192
    hidden_states2 = jax.random.normal(k_x2, (batch, seq, hidden2), jnp.float32)
    params2 = _make_params(k_p2, hidden2, max_ffn2)
    out2, _ = supernet_ffn_forward(hidden_states2, params2, active_ffn=active2,
                                   tf_cap=128)
    out2 = jax.block_until_ready(out2)
    ref2 = reference_forward(hidden_states2, params2, active_ffn=active2)
    assert jnp.allclose(out2, ref2, atol=1e-4, rtol=1e-4), "multi-pass mismatch"

    print("KERNEL_OK")
</pallas_src>

<mosaic_0001>
module attributes {stable_mosaic.version = 11 : i64} {
  func.func @_single_pass_kernel(%arg0: i32, %arg1: memref<16x32xf32, #tpu.memory_space<vmem>>, %arg2: memref<32x64xf32, #tpu.memory_space<vmem>>, %arg3: memref<1x64xf32, #tpu.memory_space<vmem>>, %arg4: memref<64x32xf32, #tpu.memory_space<vmem>>, %arg5: memref<3x32xf32, #tpu.memory_space<vmem>>, %arg6: memref<16x32xf32, #tpu.memory_space<vmem>>) attributes {dimension_semantics = [#tpu.dimension_semantics<parallel>], iteration_bounds = array<i64: 1>, scalar_prefetch = 0 : i64, scratch_operands = 0 : i64, tpu.core_type = #tpu.core_type<tc>, window_params = [{transform_indices = @transform_0, window_bounds = array<i64: 16, 32>}, {pipeline_mode = #tpu.pipeline_mode<synchronous>, transform_indices = @transform_1, window_bounds = array<i64: 32, 64>}, {pipeline_mode = #tpu.pipeline_mode<synchronous>, transform_indices = @transform_2, window_bounds = array<i64: 1, 64>}, {pipeline_mode = #tpu.pipeline_mode<synchronous>, transform_indices = @transform_3, window_bounds = array<i64: 64, 32>}, {pipeline_mode = #tpu.pipeline_mode<synchronous>, transform_indices = @transform_4, window_bounds = array<i64: 3, 32>}, {transform_indices = @transform_5, window_bounds = array<i64: 16, 32>}]} {
    %c0 = arith.constant 0 : index
    %c0_0 = arith.constant 0 : index
    %0 = vector.load %arg1[%c0, %c0_0] : memref<16x32xf32, #tpu.memory_space<vmem>>, vector<16x32xf32>
    %c0_1 = arith.constant 0 : index
    %c0_2 = arith.constant 0 : index
    %1 = vector.load %arg2[%c0_1, %c0_2] : memref<32x64xf32, #tpu.memory_space<vmem>>, vector<32x64xf32>
    %cst = arith.constant dense<0.000000e+00> : vector<16x64xf32>
    %2 = tpu.matmul %0, %1, %cst {dimension_numbers = #tpu.dot_dimension_numbers<[1], [0], [0], [1], [0, 0, 1, 1], [], []>} : vector<16x32xf32>, vector<32x64xf32>, vector<16x64xf32> -> vector<16x64xf32>
    %c0_3 = arith.constant 0 : index
    %c0_4 = arith.constant 0 : index
    %3 = vector.load %arg3[%c0_3, %c0_4] : memref<1x64xf32, #tpu.memory_space<vmem>>, vector<1x64xf32>
    %4 = vector.broadcast %3 : vector<1x64xf32> to vector<16x64xf32>
    %5 = arith.addf %2, %4 : vector<16x64xf32>
    %cst_5 = arith.constant 5.000000e-01 : f32
    %6 = vector.broadcast %cst_5 : f32 to vector<16x64xf32>
    %7 = arith.mulf %6, %5 : vector<16x64xf32>
    %cst_6 = arith.constant 0.707106769 : f32
    %8 = vector.broadcast %cst_6 : f32 to vector<16x64xf32>
    %9 = arith.mulf %5, %8 : vector<16x64xf32>
    %10 = math.erf %9 : vector<16x64xf32>
    %cst_7 = arith.constant 1.000000e+00 : f32
    %11 = vector.broadcast %cst_7 : f32 to vector<16x64xf32>
    %12 = arith.addf %11, %10 : vector<16x64xf32>
    %13 = arith.mulf %7, %12 : vector<16x64xf32>
    %c0_8 = arith.constant 0 : index
    %c0_9 = arith.constant 0 : index
    %14 = vector.load %arg4[%c0_8, %c0_9] : memref<64x32xf32, #tpu.memory_space<vmem>>, vector<64x32xf32>
    %cst_10 = arith.constant dense<0.000000e+00> : vector<16x32xf32>
    %15 = tpu.matmul %13, %14, %cst_10 {dimension_numbers = #tpu.dot_dimension_numbers<[1], [0], [0], [1], [0, 0, 1, 1], [], []>} : vector<16x64xf32>, vector<64x32xf32>, vector<16x32xf32> -> vector<16x32xf32>
    %c0_11 = arith.constant 0 : index
    %c0_12 = arith.constant 0 : index
    %16 = vector.load %arg5[%c0_11, %c0_12] : memref<3x32xf32, #tpu.memory_space<vmem>>, vector<3x32xf32>
    %17 = arith.addf %0, %15 : vector<16x32xf32>
    %18 = vector.extract_strided_slice %16 {offsets = [0, 0], sizes = [1, 32], strides = [1, 1]} : vector<3x32xf32> to vector<1x32xf32>
    %19 = vector.broadcast %18 : vector<1x32xf32> to vector<16x32xf32>
    %20 = arith.addf %17, %19 : vector<16x32xf32>
    %cst_13 = arith.constant dense<0.000000e+00> : vector<16xf32>
    %21 = vector.multi_reduction <add>, %20, %cst_13 [1] : vector<16x32xf32> to vector<16xf32>
    %22 = vector.shape_cast %21 : vector<16xf32> to vector<16x1xf32>
    %cst_14 = arith.constant 3.200000e+01 : f32
    %23 = vector.broadcast %cst_14 : f32 to vector<16x1xf32>
    %24 = arith.divf %22, %23 : vector<16x1xf32>
    %25 = vector.broadcast %24 : vector<16x1xf32> to vector<16x32xf32>
    %26 = arith.subf %20, %25 : vector<16x32xf32>
    %27 = arith.mulf %26, %26 : vector<16x32xf32>
    %cst_15 = arith.constant dense<0.000000e+00> : vector<16xf32>
    %28 = vector.multi_reduction <add>, %27, %cst_15 [1] : vector<16x32xf32> to vector<16xf32>
    %29 = vector.shape_cast %28 : vector<16xf32> to vector<16x1xf32>
    %cst_16 = arith.constant 3.200000e+01 : f32
    %30 = vector.broadcast %cst_16 : f32 to vector<16x1xf32>
    %31 = arith.divf %29, %30 : vector<16x1xf32>
    %cst_17 = arith.constant 9.99999974E-6 : f32
    %32 = vector.broadcast %cst_17 : f32 to vector<16x1xf32>
    %33 = arith.addf %31, %32 : vector<16x1xf32>
    %34 = math.rsqrt %33 : vector<16x1xf32>
    %35 = vector.broadcast %34 : vector<16x1xf32> to vector<16x32xf32>
    %36 = arith.mulf %26, %35 : vector<16x32xf32>
    %37 = vector.extract_strided_slice %16 {offsets = [1, 0], sizes = [1, 32], strides = [1, 1]} : vector<3x32xf32> to vector<1x32xf32>
    %38 = vector.broadcast %37 : vector<1x32xf32> to vector<16x32xf32>
    %39 = arith.mulf %36, %38 : vector<16x32xf32>
    %40 = vector.extract_strided_slice %16 {offsets = [2, 0], sizes = [1, 32], strides = [1, 1]} : vector<3x32xf32> to vector<1x32xf32>
    %41 = vector.broadcast %40 : vector<1x32xf32> to vector<16x32xf32>
    %42 = arith.addf %39, %41 : vector<16x32xf32>
    %c0_18 = arith.constant 0 : index
    %c0_19 = arith.constant 0 : index
    %43 = vector.load %arg6[%c0_18, %c0_19] : memref<16x32xf32, #tpu.memory_space<vmem>>, vector<16x32xf32>
    tpu.vector_store %arg6[%c0_18, %c0_19], %42 {strides = array<i32>} : memref<16x32xf32, #tpu.memory_space<vmem>>, vector<16x32xf32>,
    return
  }
  func.func @transform_0(%arg0: i32) -> (i32, i32) {
    %c0_i32 = arith.constant 0 : i32
    %c0_i32_0 = arith.constant 0 : i32
    return %arg0, %c0_i32 : i32, i32
  }
  func.func @transform_1(%arg0: i32) -> (i32, i32) {
    %c0_i32 = arith.constant 0 : i32
    %c0_i32_0 = arith.constant 0 : i32
    %c0_i32_1 = arith.constant 0 : i32
    return %c0_i32, %c0_i32_0 : i32, i32
  }
  func.func @transform_2(%arg0: i32) -> (i32, i32) {
    %c0_i32 = arith.constant 0 : i32
    %c0_i32_0 = arith.constant 0 : i32
    %c0_i32_1 = arith.constant 0 : i32
    return %c0_i32, %c0_i32_0 : i32, i32
  }
  func.func @transform_3(%arg0: i32) -> (i32, i32) {
    %c0_i32 = arith.constant 0 : i32
    %c0_i32_0 = arith.constant 0 : i32
    %c0_i32_1 = arith.constant 0 : i32
    return %c0_i32, %c0_i32_0 : i32, i32
  }
  func.func @transform_4(%arg0: i32) -> (i32, i32) {
    %c0_i32 = arith.constant 0 : i32
    %c0_i32_0 = arith.constant 0 : i32
    %c0_i32_1 = arith.constant 0 : i32
    return %c0_i32, %c0_i32_0 : i32, i32
  }
  func.func @transform_5(%arg0: i32) -> (i32, i32) {
    %c0_i32 = arith.constant 0 : i32
    %c0_i32_0 = arith.constant 0 : i32
    return %arg0, %c0_i32 : i32, i32
  }
}

</mosaic_0001>

<bundles_post_ra>
// kernel: tpu_custom_call.1
= control target key start
LH: loop header
LB: loop body
LE: loop exit
PB: predicated region body
PF: predicated region fallthrough
CT: control target
= control target key end

     0   :  { %s465_s0 = inlined_call_operand.vmem [shape: f32[16,32], index: 0, kind: input, shape index: {}]   ;;  %s466_s1 = inlined_call_operand.vmem [shape: f32[32,64], index: 1, kind: input, shape index: {}]   ;;  %s467_s2 = inlined_call_operand.vmem [shape: f32[1,64], index: 2, kind: input, shape index: {}]   ;;  %s468_s3 = inlined_call_operand.vmem [shape: f32[64,32], index: 3, kind: input, shape index: {}]   ;;  %s469_s4 = inlined_call_operand.vmem [shape: f32[3,32], index: 4, kind: input, shape index: {}]   ;;  %s470_s5 = inlined_call_operand.hbm [shape: f32[16,32], index: 5, kind: output, shape index: {}]  }
   0x1   :  { %v26_v0 = vld [vmem:[%s466_s1 + $0x18] sm:$0xff]  ;;  %v25_v1 = vld [vmem:[%s466_s1 + $0x10] sm:$0xff]  ;;  %v24_v2 = vld [vmem:[%s466_s1 + $0x8] sm:$0xff] }
   0x2   :  { %50 = vmatpush.msra.mxu0 %v26_v0  ;;  %276 = vmatpush.msra.mxu3 %v26_v0 }
   0x3   :  { %10 = vsyncpa [#allocation3], 0  ;;  %v23_v3 = vld [vmem:[%s466_s1] sm:$0xff]  ;;  %vm31_vm0 = vcmask 261120   ;;  %v383_v5 = vld [vmem:[%s465_s0 + $0x8] sm:$0xff]  ;;  %vm157_vm9 = vcmask 523264  }
   0x4   :  { %51 = vmatpush.msra.mxu0 %v25_v1  ;;  %277 = vmatpush.msra.mxu3 %v25_v1  ;;  %v378_v4 = vld [vmem:[%s465_s0] sm:$0xff]  ;;  %v156_v14 = vld [vmem:[%s468_s3 + $0x38] sm:$0xff]  ;;  %v155_v18 = vld [vmem:[%s468_s3 + $0x30] sm:$0xff]  ;;  %s258_s24 = sshll.u32 %s470_s5, 4  ;;  %s331_s25 = smov 128   ;;  %s259_s24 = int_to_ptr.hbm [resolvable:$true] %s258_s24 }
   0x5   :  { %v292_v6 = vld [vmem:[%s467_s2] ss:$0 sm:$0xff]  ;;  %172 = vmatpush.msra.mxu1 %v156_v14  ;;  %280 = vmatpush.msra.mxu2 %v156_v14  ;;  %v154_v22 = vld [vmem:[%s468_s3 + $0x28] sm:$0xff]  ;;  %v152_v31 = vld [vmem:[%s468_s3 + $0x18] sm:$0xff]  ;;  %s332_s26 = smov 8  }
   0x6   :  { %52 = vmatpush.msra.mxu0 %v24_v2  ;;  %278 = vmatpush.msra.mxu3 %v24_v2  ;;  %v153_v26 = vld [vmem:[%s468_s3 + $0x20] sm:$0xff]  ;;  %v151_v35 = vld [vmem:[%s468_s3 + $0x10] sm:$0xff]  ;;  %v150_v40 = vld [vmem:[%s468_s3 + $0x8] sm:$0xff] }
   0x7   :  { %173 = vmatpush.msra.mxu1 %v155_v18  ;;  %281 = vmatpush.msra.mxu2 %v155_v18  ;;  %v149_v42 = vld [vmem:[%s468_s3] sm:$0xff] }
   0x8   :  { %53 = vmatpush.msra.mxu0 %v23_v3  ;;  %279 = vmatpush.msra.mxu3 %v23_v3 }
   0x9   :  { %270 = vmatmul.msk.f32.vlgmr.msra.gmra.mxu0 %vm31_vm0, %v378_v4  ;;  %271 = vmatmul.msk.f32.vlgmr.msra.gmra.mxu3 %vm31_vm0, %v383_v5 }
   0xa   :  { %174 = vmatpush.msra.mxu1 %v154_v22  ;;  %282 = vmatpush.msra.mxu2 %v154_v22 }
   0xc   :  { %175 = vmatpush.msra.mxu1 %v153_v26  ;;  %283 = vmatpush.msra.mxu2 %v153_v26 }
   0xe   :  { %176 = vmatpush.msra.mxu1 %v152_v31  ;;  %284 = vmatpush.msra.mxu2 %v152_v31 }
  0x10   :  { %177 = vmatpush.msra.mxu1 %v151_v35  ;;  %285 = vmatpush.msra.mxu2 %v151_v35 }
  0x12   :  { %178 = vmatpush.msra.mxu1 %v150_v40  ;;  %286 = vmatpush.msra.mxu2 %v150_v40 }
  0x14   :  { %179 = vmatpush.msra.mxu1 %v149_v42  ;;  %287 = vmatpush.msra.mxu2 %v149_v42 }
  0x86   :  { %v55_v7 = vpop.f32.mrf.mxu0 }
  0x87   :  { %v392_v8 = vadd.f32 %v292_v6, %v55_v7 }
  0x89   :  { %v395_v9 = vmul.f32 0.70710677, %v392_v8 }
  0x8b   :  { %v65_v10 = vmul.f32 %v395_v9, %v395_v9 }
  0x8c   :  { %v58_v11 = vpop.f32.mrf.mxu3 }
  0x8d   :  { %v399_v12 = vmin.f32 %v65_v10, 16.0  ;;  %v401_v13 = vadd.f32 %v292_v6, %v58_v11 }
  0x8f   :  { %v67_v15 = vmul.f32 2.1237322e-06, %v399_v12  ;;  %v78_v16 = vmul.f32 3.8918573e-05, %v399_v12  ;;  %v409_v17 = vmul.f32 0.70710677, %v401_v13 }
  0x90   :  { %v62_v35 = vmul.f32 0.5, %v401_v13 }
  0x91   :  { %v68_v19 = vadd.f32 0.00028619796, %v67_v15  ;;  %v79_v20 = vadd.f32 0.001143296, %v78_v16  ;;  %v105_v21 = vmul.f32 %v409_v17, %v409_v17 }
  0x93   :  { %v69_v23 = vmul.f32 %v68_v19, %v399_v12  ;;  %v80_v24 = vmul.f32 %v79_v20, %v399_v12  ;;  %v106_v25 = vmin.f32 %v105_v21, 16.0 }
  0x95   :  { %v70_v27 = vadd.f32 0.0036580483, %v69_v23  ;;  %v81_v28 = vadd.f32 0.014752088, %v80_v24  ;;  %v107_v29 = vmul.f32 2.1237322e-06, %v106_v25 }
  0x96   :  { %v118_v30 = vmul.f32 3.8918573e-05, %v106_v25 }
  0x97   :  { %v82_v32 = vmul.f32 %v81_v28, %v399_v12  ;;  %v108_v33 = vadd.f32 0.00028619796, %v107_v29  ;;  %v71_v37 = vmul.f32 %v70_v27, %v399_v12  ;;  %v61_v28 = vmul.f32 0.5, %v392_v8  ;;  %v449_v8 = vld [vmem:[%s469_s4] sm:$0x7]  ;;  %s330_s4 = smov [#allocation2]  }
  0x98   :  { %v119_v34 = vadd.f32 0.001143296, %v118_v30  ;;  %s256_s21 = sshll.u32 %s330_s4, 4  ;;  %s257_s21 = int_to_ptr.vmem [resolvable:$true] %s256_s21 }
  0x99   :  { %v83_v36 = vadd.f32 0.112945676, %v82_v32  ;;  %v109_v38 = vmul.f32 %v108_v33, %v106_v25  ;;  %v72_v46 = vadd.f32 0.05243302, %v71_v37 }
  0x9a   :  { %v120_v39 = vmul.f32 %v119_v34, %v106_v25 }
  0x9b   :  { %v84_v41 = vmul.f32 %v83_v36, %v399_v12  ;;  %v110_v45 = vadd.f32 0.0036580483, %v109_v38  ;;  %v73_v52 = vmul.f32 %v72_v46, %v399_v12 }
  0x9c   :  { %v121_v43 = vadd.f32 0.014752088, %v120_v39 }
  0x9d   :  { %v85_v44 = vadd.f32 0.4994258, %v84_v41  ;;  %v111_v51 = vmul.f32 %v110_v45, %v106_v25  ;;  %v74_v56 = vadd.f32 0.18741608, %v73_v52  ;;  %v329_v45 = vmov 32.0  }
  0x9e   :  { %v122_v47 = vmul.f32 %v121_v43, %v106_v25 }
  0x9f   :  { %v86_v48 = vmul.f32 %v85_v44, %v399_v12  ;;  %v112_v55 = vadd.f32 0.05243302, %v111_v51  ;;  %v75_v61 = vmul.f32 %v74_v56, %v399_v12 }
  0xa0   :  { %v123_v49 = vadd.f32 0.112945676, %v122_v47 }
  0xa1   :  { %v87_v50 = vadd.f32 1.0, %v86_v48  ;;  %v113_v60 = vmul.f32 %v112_v55, %v106_v25  ;;  %v76_v2 = vadd.f32 1.1283791, %v75_v61 }
  0xa2   :  { %v124_v53 = vmul.f32 %v123_v49, %v106_v25 }
  0xa3   :  { %293 = vrcp.f32 %v87_v50  ;;  %v99_v0 = vand.u32 2147483648, %v87_v50  ;;  %v114_v1 = vadd.f32 0.18741608, %v113_v60  ;;  %v97_v6 = vand.u32 2147483647, %v87_v50 }
  0xa4   :  { %v125_v54 = vadd.f32 0.4994258, %v124_v53  ;;  %vm93_vm2 = vweird.f32 %v87_v50  ;;  %v77_v16 = vmul.f32 %v76_v2, %v395_v9 }
  0xa5   :  { %v100_v11 = vor.u32 1.1754944e-38, %v99_v0  ;;  %v115_v14 = vmul.f32 %v114_v1, %v106_v25  ;;  %vm98_vm4 = vcmp.eq.f32.partialorder %v97_v6, 8.507059e+37 }
  0xa6   :  { %v126_v57 = vmul.f32 %v125_v54, %v106_v25 }
  0xa7   :  { %v116_v22 = vadd.f32 1.1283791, %v115_v14  ;;  %v244_v14 = vperm.slane %v449_v8, 1 }
  0xa8   :  { %v127_v58 = vadd.f32 1.0, %v126_v57 }
  0xa9   :  { %v294_v59 = vpop.eup %293  ;;  %v117_v9 = vmul.f32 %v116_v22, %v409_v17  ;;  %v190_v17 = vperm.slane %v449_v8, 0 }
  0xaa   :  { %v89_v62 = vmul.f32 %v294_v59, %v87_v50  ;;  %295 = vrcp.f32 %v127_v58  ;;  %vm94_vm1 = vweird.f32 %v294_v59  ;;  %v139_v21 = vand.u32 2147483648, %v127_v58 }
  0xab   :  { %vm95_vm3 = vmor %vm93_vm2, %vm94_vm1  ;;  %v137_v24 = vand.u32 2147483647, %v127_v58  ;;  %vm133_vm6 = vweird.f32 %v127_v58  ;;  %297 = vrcp.f32 %v329_v45 }
  0xac   :  { %v90_v63 = vsub.f32 1.0, %v89_v62  ;;  %v140_v25 = vor.u32 1.1754944e-38, %v139_v21 }
  0xad   :  { %vm138_vm8 = vcmp.eq.f32.partialorder %v137_v24, 8.507059e+37 }
  0xae   :  { %v91_v3 = vmul.f32 %v294_v59, %v90_v63 }
  0xb0   :  { %v296_v7 = vpop.eup %295  ;;  %v92_v10 = vadd.f32 %v294_v59, %v91_v3 }
  0xb1   :  { %v129_v15 = vmul.f32 %v296_v7, %v127_v58  ;;  %vm134_vm5 = vweird.f32 %v296_v7  ;;  %v298_v46 = vpop.eup %297 }
  0xb2   :  { %v96_v18 = vsel %vm95_vm3, %v294_v59, %v92_v10  ;;  %vm135_vm7 = vmor %vm133_vm6, %vm134_vm5  ;;  %v200_v47 = vmul.f32 32.0, %v298_v46  ;;  %vm204_vm10 = vweird.f32 %v298_v46 }
  0xb3   :  { %v101_v12 = vsel %vm98_vm4, %v100_v11, %v96_v18  ;;  %v130_v19 = vsub.f32 1.0, %v129_v15 }
  0xb4   :  { %v102_v20 = vmul.f32 %v101_v12, %v77_v16  ;;  %v201_v48 = vsub.f32 1.0, %v200_v47  ;;  %v247_v16 = vperm.slane %v449_v8, 2 }
  0xb5   :  { %v131_v23 = vmul.f32 %v296_v7, %v130_v19 }
  0xb6   :  { %v272_v26 = vclamps-f32 %v102_v20, 1.0  ;;  %v202_v49 = vmul.f32 %v298_v46, %v201_v48 }
  0xb7   :  { %v132_v27 = vadd.f32 %v296_v7, %v131_v23 }
  0xb8   :  { %v145_v29 = vadd.f32 1.0, %v272_v26  ;;  %v203_v50 = vadd.f32 %v298_v46, %v202_v49 }
  0xb9   :  { %v136_v30 = vsel %vm135_vm7, %v296_v7, %v132_v27 }
  0xba   :  { %v141_v31 = vsel %vm138_vm8, %v140_v25, %v136_v30  ;;  %v147_v32 = vmul.f32 %v145_v29, %v61_v28 }
  0xbb   :  { %v142_v33 = vmul.f32 %v141_v31, %v117_v9 }
  0xbc   :  { %274 = vmatmul.msk.f32.vlgmr.msra.gmra.mxu1 %vm157_vm9, %v147_v32 }
  0xbd   :  { %v273_v34 = vclamps-f32 %v142_v33, 1.0 }
  0xbf   :  { %v146_v36 = vadd.f32 1.0, %v273_v34 }
  0xc1   :  { %v148_v37 = vmul.f32 %v146_v36, %v62_v35 }
  0xc3   :  { %275 = vmatmul.msk.f32.vlgmr.msra.gmra.mxu2 %vm157_vm9, %v148_v37 }
 0x139   :  { %v181_v38 = vpop.f32.mrf.mxu1 }
 0x13a   :  { %v188_v39 = vadd.f32 %v181_v38, %v378_v4  ;;  %v205_v4 = vsel %vm204_vm10, %v298_v46, %v203_v50 }
 0x13c   :  { %v191_v40 = vadd.f32 %v190_v17, %v188_v39 }
 0x13e   :  { %v193_v41 = vsel %vm31_vm0, %v191_v40, 0.0 }
 0x13f   :  { %194 = vadd.xlane.f32.xlu0 %v193_v41 }
 0x146   :  { %v184_v42 = vpop.f32.mrf.mxu2 }
 0x147   :  { %v189_v13 = vadd.f32 %v184_v42, %v383_v5 }
 0x149   :  { %v192_v43 = vadd.f32 %v190_v17, %v189_v13 }
 0x14b   :  { %v196_v44 = vsel %vm31_vm0, %v192_v43, 0.0 }
 0x14c   :  { %197 = vadd.xlane.f32.xlu0 %v196_v44 }
 0x1b2   :  { %v195_v51 = vpop.xlane.xlu0 %194 }
 0x1b3   :  { %v206_v52 = vmul.f32 %v205_v4, %v195_v51 }
 0x1b5   :  { %v208_v53 = vsub.f32 %v191_v40, %v206_v52 }
 0x1b7   :  { %v210_v54 = vmul.f32 %v208_v53, %v208_v53 }
 0x1b9   :  { %v212_v55 = vsel %vm31_vm0, %v210_v54, 0.0 }
 0x1ba   :  { %213 = vadd.xlane.f32.xlu1 %v212_v55 }
 0x1bf   :  { %v198_v5 = vpop.xlane.xlu0 %197 }
 0x1c0   :  { %v207_v56 = vmul.f32 %v205_v4, %v198_v5 }
 0x1c2   :  { %v209_v57 = vsub.f32 %v192_v43, %v207_v56 }
 0x1c4   :  { %v211_v58 = vmul.f32 %v209_v57, %v209_v57 }
 0x1c6   :  { %v215_v59 = vsel %vm31_vm0, %v211_v58, 0.0 }
 0x1c7   :  { %216 = vadd.xlane.f32.xlu1 %v215_v59 }
 0x22d   :  { %v214_v60 = vpop.xlane.xlu1 %213 }
 0x22e   :  { %v218_v61 = vmul.f32 %v214_v60, %v205_v4 }
 0x230   :  { %v220_v62 = vadd.f32 1e-05, %v218_v61 }
 0x232   :  { %299 = vrsqrt.f32 %v220_v62  ;;  %vm228_vm12 = vweird.f32 %v220_v62 }
 0x238   :  { %v300_v63 = vpop.eup %299 }
 0x239   :  { %v223_v0 = vmul.f32 %v300_v63, %v220_v62  ;;  %vm229_vm11 = vweird.f32 %v300_v63 }
 0x23a   :  { %v217_v1 = vpop.xlane.xlu1 %216  ;;  %vm230_vm13 = vmor %vm228_vm12, %vm229_vm11 }
 0x23b   :  { %v224_v2 = vmul.f32 %v300_v63, %v223_v0  ;;  %v219_v3 = vmul.f32 %v217_v1, %v205_v4 }
 0x23d   :  { %v225_v6 = vmul.f32 0.5, %v224_v2  ;;  %v221_v7 = vadd.f32 1e-05, %v219_v3 }
 0x23f   :  { %v226_v10 = vsub.f32 1.5, %v225_v6  ;;  %301 = vrsqrt.f32 %v221_v7  ;;  %vm238_vm15 = vweird.f32 %v221_v7 }
 0x241   :  { %v227_v11 = vmul.f32 %v300_v63, %v226_v10 }
 0x243   :  { %v231_v15 = vsel %vm230_vm13, %v300_v63, %v227_v11 }
 0x244   :  { %v242_v18 = vmul.f32 %v231_v15, %v208_v53 }
 0x245   :  { %v302_v12 = vpop.eup %301 }
 0x246   :  { %v245_v19 = vmul.f32 %v244_v14, %v242_v18  ;;  %v233_v20 = vmul.f32 %v302_v12, %v221_v7  ;;  %vm239_vm14 = vweird.f32 %v302_v12 }
 0x247   :  { %vm240_vm1 = vmor %vm238_vm15, %vm239_vm14 }
 0x248   :  { %v234_v21 = vmul.f32 %v302_v12, %v233_v20  ;;  %v248_v22 = vadd.f32 %v247_v16, %v245_v19 }
 0x24a   :  { %v235_v23 = vmul.f32 0.5, %v234_v21  ;;  %250 = vst.msk [vmem:[#allocation2] sm:$0xff] %vm31_vm0, %v248_v22 }
 0x24c   :  { %v236_v24 = vsub.f32 1.5, %v235_v23 }
 0x24e   :  { %v237_v26 = vmul.f32 %v302_v12, %v236_v24 }
 0x250   :  { %v241_v27 = vsel %vm240_vm1, %v302_v12, %v237_v26 }
 0x251   :  { %v243_v28 = vmul.f32 %v241_v27, %v209_v57 }
 0x253   :  { %v246_v25 = vmul.f32 %v244_v14, %v243_v28 }
 0x255   :  { %v249_v29 = vadd.f32 %v247_v16, %v246_v25 }
 0x257   :  { %251 = vst.msk [vmem:[#allocation2 + $0x8] sm:$0xff] %vm31_vm0, %v249_v29 }
 0x258   :  { %264 = dma.vmem_to_hbm [thread:$0]  %s257_s21, 256, %s259_s24, [#allocation3], %s331_s25, %s331_s25, %s332_s26  }
 0x259   :  { %327 = dma.done.wait [#allocation3], 256  }
 0x25a   :  { %328 = vsyncadd [#allocation3], 4294967040 }
 0x25b   :  { %269 = vsyncpa [#allocation3], 1 }

</bundles_post_ra>
